<compile_context>
chip_gen: v7x
topology: tpu7x:2x2x1
jax: 0.10.0
libtpu: 0.0.40
codegen_flags: <defaults>
</compile_context>

<pallas_src>
import numpy as np
import jax
import jax.numpy as jnp
from jax.experimental import pallas as pl
from jax.experimental.pallas import tpu as pltpu


def _round_up(a, b):
    return -(-a // b) * b


def _choose_spatial_tile(M, C, act_bytes, out_bytes,
                         vmem_budget=16 << 20, tm_target=4096):
    """Largest lane-dense spatial tile keeping pass-2 live VMEM under budget.

    Pass 2 holds (x1 + x2 + out) blocks, double-buffered:
        live ~= 2 * (2 * act_bytes + out_bytes) * C * tm   (+ tiny weights/vectors)
    The 16 MiB budget is conservative enough for the default scoped-VMEM limits of
    v5e (16 MiB), v6e (32 MiB) and v7x (32 MiB of 64 MiB physical) without flags.
    """
    per_col = 2 * (2 * act_bytes + out_bytes) * C
    tm_cap = max(128, (vmem_budget // per_col) // 128 * 128)
    tm = min(tm_target, tm_cap, _round_up(M, 128))
    return max(128, (tm // 128) * 128)


def interaction_block_forward(w, gamma, beta, x1, x2, eps=1e-5):
    """InteractionBlock forward: x2 + sigmoid(BN(conv1x1(cat(x1, x2)))) * x1.

    w:      (C, 2C, 1, 1) conv weight (torch layout, bias-free)
    gamma:  (C,) BN weight;  beta: (C,) BN bias
    x1, x2: (N, C, H, W); result keeps x2's dtype (torch mutates x2 in place).
    BN uses per-call batch statistics (training mode, biased variance).
    # TODO(synk): BatchNorm2d running_mean/running_var buffer updates (a training
    # side effect) are not reproduced here.
    """
    N, C, H, W = x1.shape
    M = H * W
    out_dtype = x2.dtype

    # Free reshapes: spatial becomes the lane axis. No padding copies.
    x1m = x1.reshape(N, C, M)
    x2m = x2.reshape(N, C, M)

    # Split the weight once: conv over cat(x1, x2) == W1 @ x1 + W2 @ x2.
    wm = w.reshape(C, 2 * C).astype(jnp.float32)
    w1 = wm[:, :C].astype(jnp.bfloat16)
    w2 = wm[:, C:].astype(jnp.bfloat16)

    tm = _choose_spatial_tile(M, C, x1m.dtype.itemsize, jnp.dtype(out_dtype).itemsize)
    Mt = pl.cdiv(M, tm)
    # Spatial tiles: outer "parallel" x inner "arbitrary" (stats accumulate on inner).
    Mo = 2 if (Mt % 2 == 0 and Mt >= 2) else 1
    Mi = Mt // Mo
    ragged = (M % tm) != 0

    def conv_tile(w1_ref, w2_ref, x1_t, x2_t):
        # bf16 MXU inputs, f32 accumulation. Two K=C dots keep the layout simple;
        # MXU underfill only matters once the kernel stops being HBM-bound.
        y = jnp.dot(w1_ref[...], x1_t.astype(jnp.bfloat16),
                    preferred_element_type=jnp.float32)
        return y + jnp.dot(w2_ref[...], x2_t.astype(jnp.bfloat16),
                           preferred_element_type=jnp.float32)

    # ---- Pass 1: BN batch statistics, accumulated in the VMEM-resident output block
    # across the inner ("arbitrary") spatial axis -> only N*Mo small HBM stores total.
    def stats_kernel(x1_ref, x2_ref, w1_ref, w2_ref, stats_ref):
        mi = pl.program_id(2)

        @pl.when(mi == 0)
        def _():
            stats_ref[...] = jnp.zeros_like(stats_ref)

        y = conv_tile(w1_ref, w2_ref, x1_ref[0], x2_ref[0])          # (C, tm) f32
        if ragged:
            base = (pl.program_id(1) * Mi + mi) * tm
            col = jax.lax.broadcasted_iota(jnp.int32, (1, tm), 1) + base
            y = jnp.where(col < M, y, 0.0)                            # NaN-safe mask
        # TODO(synk): one-pass E[y^2]-E[y]^2 can cancel when |mean| >> std; a shifted or
        # Welford formulation would be more robust for far-from-zero-mean conv outputs.
        s = jnp.sum(y, axis=1, keepdims=True)                         # (C, 1)
        q = jnp.sum(y * y, axis=1, keepdims=True)                     # (C, 1)
        stats_ref[0, 0, :, :] = stats_ref[0, 0, :, :] + jnp.concatenate([s, q], axis=1)

    act_spec_p1 = pl.BlockSpec((1, C, tm), lambda n, o, i: (n, 0, o * Mi + i))
    wgt_spec_p1 = pl.BlockSpec((C, C), lambda n, o, i: (0, 0))
    partial = pl.pallas_call(
        stats_kernel,
        out_shape=jax.ShapeDtypeStruct((N, Mo, C, 2), jnp.float32),
        grid=(N, Mo, Mi),
        in_specs=[act_spec_p1, act_spec_p1, wgt_spec_p1, wgt_spec_p1],
        out_specs=pl.BlockSpec((1, 1, C, 2), lambda n, o, i: (n, o, 0, 0)),
        compiler_params=pltpu.CompilerParams(
            dimension_semantics=("parallel", "parallel", "arbitrary")),
    )(x1m, x2m, w1, w2)

    # Tiny (C,)-sized statistics math in plain JAX.
    tot = jnp.sum(partial, axis=(0, 1))                      # (C, 2)
    count = float(N * M)                                     # masked columns contribute 0
    mean = tot[:, 0] / count
    var = jnp.maximum(tot[:, 1] / count - mean * mean, 0.0)  # biased var (BN train mode)
    inv = jax.lax.rsqrt(var + eps)
    g32 = gamma.astype(jnp.float32)
    scale = (g32 * inv).reshape(C, 1)
    shift = (beta.astype(jnp.float32) - mean * g32 * inv).reshape(C, 1)

    # ---- Pass 2: recompute the cheap GEMM; fuse BN affine + sigmoid + gated residual.
    # x2 is aliased to the output (in-place `x2 +=`); result keeps x2's dtype.
    def apply_kernel(x1_ref, x2_ref, w1_ref, w2_ref, scale_ref, shift_ref, o_ref):
        x1_t = x1_ref[0]
        x2_t = x2_ref[0]
        y = conv_tile(w1_ref, w2_ref, x1_t, x2_t)                     # (C, tm) f32
        z = y * scale_ref[...] + shift_ref[...]                       # fused BN affine
        g = 0.5 * (jnp.tanh(0.5 * z) + 1.0)                           # sigmoid on the EUP
        res = x2_t.astype(jnp.float32) + g * x1_t.astype(jnp.float32)
        o_ref[0, :, :] = res.astype(o_ref.dtype)

    act_spec_p2 = pl.BlockSpec((1, C, tm), lambda n, m: (n, 0, m))
    wgt_spec_p2 = pl.BlockSpec((C, C), lambda n, m: (0, 0))
    vec_spec_p2 = pl.BlockSpec((C, 1), lambda n, m: (0, 0))
    out = pl.pallas_call(
        apply_kernel,
        out_shape=jax.ShapeDtypeStruct((N, C, M), out_dtype),
        grid=(N, Mt),
        in_specs=[act_spec_p2, act_spec_p2, wgt_spec_p2, wgt_spec_p2,
                  vec_spec_p2, vec_spec_p2],
        out_specs=act_spec_p2,
        input_output_aliases={1: 0},                 # reuse x2's HBM buffer for the result
        compiler_params=pltpu.CompilerParams(
            dimension_semantics=("parallel", "parallel")),
    )(x1m, x2m, w1, w2, scale, shift)

    return out.reshape(N, C, H, W)


# ----------------------------- pure-JAX reference (f32) -----------------------------

def reference_forward(w, gamma, beta, x1, x2, eps=1e-5):
    C = x1.shape[1]
    xcat = jnp.concatenate([x1, x2], axis=1)                       # (N, 2C, H, W)
    wm = w.reshape(C, 2 * C)
    y = jnp.einsum('oc,nchw->nohw', wm, xcat)
    mean = jnp.mean(y, axis=(0, 2, 3), keepdims=True)
    var = jnp.var(y, axis=(0, 2, 3), keepdims=True)                # biased (train-mode BN)
    yn = (y - mean) / jnp.sqrt(var + eps)
    yn = yn * gamma[None, :, None, None] + beta[None, :, None, None]
    return x2 + jax.nn.sigmoid(yn) * x1


# ----------------------------- main -----------------------------

if __name__ == "__main__":
    N, C, H, W = 2, 8, 16, 16          # small but sublane/lane friendly (model uses C=64)
    key = jax.random.PRNGKey(0)
    k1, k2, k3, k4, k5 = jax.random.split(key, 5)
    x1 = jax.random.normal(k1, (N, C, H, W), jnp.float32)
    x2 = jax.random.normal(k2, (N, C, H, W), jnp.float32)
    w = jax.random.normal(k3, (C, 2 * C, 1, 1), jnp.float32) / np.sqrt(2 * C)
    gamma = 1.0 + 0.1 * jax.random.normal(k4, (C,), jnp.float32)
    beta = 0.1 * jax.random.normal(k5, (C,), jnp.float32)

    # Reference first: x2 is donated to the kernel so the aliased output is truly in-place.
    ref = reference_forward(w, gamma, beta, x1, x2)

    fwd = jax.jit(interaction_block_forward, donate_argnums=(4,))
    out = jax.block_until_ready(fwd(w, gamma, beta, x1, x2))

    assert out.shape == (N, C, H, W)
    assert out.dtype == jnp.float32
    # bf16 MXU inputs with f32 accumulation -> small numeric delta vs the f32 reference.
    np.testing.assert_allclose(np.asarray(out), np.asarray(ref), atol=3e-2, rtol=3e-2)

    print("KERNEL_OK")
</pallas_src>

<mosaic_0001>
module attributes {stable_mosaic.version = 11 : i64} {
  func.func @stats_kernel(%arg0: i32, %arg1: i32, %arg2: i32, %arg3: memref<1x8x256xf32, #tpu.memory_space<vmem>>, %arg4: memref<1x8x256xf32, #tpu.memory_space<vmem>>, %arg5: memref<8x8xbf16, #tpu.memory_space<vmem>>, %arg6: memref<8x8xbf16, #tpu.memory_space<vmem>>, %arg7: memref<1x1x8x2xf32, #tpu.memory_space<vmem>>) attributes {dimension_semantics = [#tpu.dimension_semantics<parallel>, #tpu.dimension_semantics<parallel>, #tpu.dimension_semantics<arbitrary>], iteration_bounds = array<i64: 2, 1, 1>, scalar_prefetch = 0 : i64, scratch_operands = 0 : i64, tpu.core_type = #tpu.core_type<tc>, window_params = [{transform_indices = @transform_0, window_bounds = array<i64: 1, 8, 256>}, {transform_indices = @transform_1, window_bounds = array<i64: 1, 8, 256>}, {pipeline_mode = #tpu.pipeline_mode<synchronous>, transform_indices = @transform_2, window_bounds = array<i64: 8, 8>}, {pipeline_mode = #tpu.pipeline_mode<synchronous>, transform_indices = @transform_3, window_bounds = array<i64: 8, 8>}, {transform_indices = @transform_4, window_bounds = array<i64: 1, 1, 8, 2>}]} {
    %c0_i32 = arith.constant 0 : i32
    %0 = arith.cmpi eq, %arg2, %c0_i32 : i32
    %1 = arith.extui %0 : i1 to i32
    %c0_i32_0 = arith.constant 0 : i32
    %2 = arith.cmpi ne, %1, %c0_i32_0 : i32
    scf.if %2 {
      %cst_21 = arith.constant 0.000000e+00 : f32
      %26 = vector.broadcast %cst_21 : f32 to vector<1x1x8x2xf32>
      %c0_22 = arith.constant 0 : index
      %c0_23 = arith.constant 0 : index
      %c0_24 = arith.constant 0 : index
      %c0_25 = arith.constant 0 : index
      %27 = vector.load %arg7[%c0_22, %c0_23, %c0_24, %c0_25] : memref<1x1x8x2xf32, #tpu.memory_space<vmem>>, vector<1x1x8x2xf32>
      tpu.vector_store %arg7[%c0_22, %c0_23, %c0_24, %c0_25], %26 {strides = array<i32>} : memref<1x1x8x2xf32, #tpu.memory_space<vmem>>, vector<1x1x8x2xf32>,
    } else {
    }
    %c0 = arith.constant 0 : index
    %c0_1 = arith.constant 0 : index
    %c0_2 = arith.constant 0 : index
    %3 = vector.load %arg3[%c0, %c0_1, %c0_2] : memref<1x8x256xf32, #tpu.memory_space<vmem>>, vector<1x8x256xf32>
    %4 = vector.shape_cast %3 : vector<1x8x256xf32> to vector<8x256xf32>
    %c0_3 = arith.constant 0 : index
    %c0_4 = arith.constant 0 : index
    %c0_5 = arith.constant 0 : index
    %5 = vector.load %arg4[%c0_3, %c0_4, %c0_5] : memref<1x8x256xf32, #tpu.memory_space<vmem>>, vector<1x8x256xf32>
    %6 = vector.shape_cast %5 : vector<1x8x256xf32> to vector<8x256xf32>
    %c0_6 = arith.constant 0 : index
    %c0_7 = arith.constant 0 : index
    %7 = vector.load %arg5[%c0_6, %c0_7] : memref<8x8xbf16, #tpu.memory_space<vmem>>, vector<8x8xbf16>
    %8 = arith.truncf %4 : vector<8x256xf32> to vector<8x256xbf16>
    %cst = arith.constant dense<0.000000e+00> : vector<8x256xf32>
    %9 = tpu.matmul %7, %8, %cst {dimension_numbers = #tpu.dot_dimension_numbers<[1], [0], [0], [1], [0, 0, 1, 1], [], []>} : vector<8x8xbf16>, vector<8x256xbf16>, vector<8x256xf32> -> vector<8x256xf32>
    %c0_8 = arith.constant 0 : index
    %c0_9 = arith.constant 0 : index
    %10 = vector.load %arg6[%c0_8, %c0_9] : memref<8x8xbf16, #tpu.memory_space<vmem>>, vector<8x8xbf16>
    %11 = arith.truncf %6 : vector<8x256xf32> to vector<8x256xbf16>
    %cst_10 = arith.constant dense<0.000000e+00> : vector<8x256xf32>
    %12 = tpu.matmul %10, %11, %cst_10 {dimension_numbers = #tpu.dot_dimension_numbers<[1], [0], [0], [1], [0, 0, 1, 1], [], []>} : vector<8x8xbf16>, vector<8x256xbf16>, vector<8x256xf32> -> vector<8x256xf32>
    %13 = arith.addf %9, %12 : vector<8x256xf32>
    %cst_11 = arith.constant dense<0.000000e+00> : vector<8xf32>
    %14 = vector.multi_reduction <add>, %13, %cst_11 [1] : vector<8x256xf32> to vector<8xf32>
    %15 = vector.shape_cast %14 : vector<8xf32> to vector<8x1xf32>
    %16 = arith.mulf %13, %13 : vector<8x256xf32>
    %cst_12 = arith.constant dense<0.000000e+00> : vector<8xf32>
    %17 = vector.multi_reduction <add>, %16, %cst_12 [1] : vector<8x256xf32> to vector<8xf32>
    %18 = vector.shape_cast %17 : vector<8xf32> to vector<8x1xf32>
    %c0_13 = arith.constant 0 : index
    %c0_14 = arith.constant 0 : index
    %c0_15 = arith.constant 0 : index
    %c0_16 = arith.constant 0 : index
    %19 = vector.load %arg7[%c0_13, %c0_14, %c0_15, %c0_16] : memref<1x1x8x2xf32, #tpu.memory_space<vmem>>, vector<1x1x8x2xf32>
    %20 = vector.shape_cast %19 : vector<1x1x8x2xf32> to vector<8x2xf32>
    %21 = tpu.concatenate %15, %18 in 1 : vector<8x1xf32>, vector<8x1xf32> -> vector<8x2xf32>
    %22 = arith.addf %20, %21 : vector<8x2xf32>
    %c0_17 = arith.constant 0 : index
    %c0_18 = arith.constant 0 : index
    %c0_19 = arith.constant 0 : index
    %c0_20 = arith.constant 0 : index
    %23 = vector.load %arg7[%c0_17, %c0_18, %c0_19, %c0_20] : memref<1x1x8x2xf32, #tpu.memory_space<vmem>>, vector<1x1x8x2xf32>
    %24 = vector.shape_cast %23 : vector<1x1x8x2xf32> to vector<8x2xf32>
    %25 = vector.shape_cast %22 : vector<8x2xf32> to vector<1x1x8x2xf32>
    tpu.vector_store %arg7[%c0_17, %c0_18, %c0_19, %c0_20], %25 {strides = array<i32>} : memref<1x1x8x2xf32, #tpu.memory_space<vmem>>, vector<1x1x8x2xf32>,
    return
  }
  func.func @transform_0(%arg0: i32, %arg1: i32, %arg2: i32) -> (i32, i32, i32) {
    %c1_i32 = arith.constant 1 : i32
    %0 = arith.muli %arg1, %c1_i32 : i32
    %1 = arith.addi %0, %arg2 : i32
    %c0_i32 = arith.constant 0 : i32
    %c0_i32_0 = arith.constant 0 : i32
    return %arg0, %c0_i32, %1 : i32, i32, i32
  }
  func.func @transform_1(%arg0: i32, %arg1: i32, %arg2: i32) -> (i32, i32, i32) {
    %c1_i32 = arith.constant 1 : i32
    %0 = arith.muli %arg1, %c1_i32 : i32
    %1 = arith.addi %0, %arg2 : i32
    %c0_i32 = arith.constant 0 : i32
    %c0_i32_0 = arith.constant 0 : i32
    return %arg0, %c0_i32, %1 : i32, i32, i32
  }
  func.func @transform_2(%arg0: i32, %arg1: i32, %arg2: i32) -> (i32, i32) {
    %c0_i32 = arith.constant 0 : i32
    %c0_i32_0 = arith.constant 0 : i32
    %c0_i32_1 = arith.constant 0 : i32
    return %c0_i32, %c0_i32_0 : i32, i32
  }
  func.func @transform_3(%arg0: i32, %arg1: i32, %arg2: i32) -> (i32, i32) {
    %c0_i32 = arith.constant 0 : i32
    %c0_i32_0 = arith.constant 0 : i32
    %c0_i32_1 = arith.constant 0 : i32
    return %c0_i32, %c0_i32_0 : i32, i32
  }
  func.func @transform_4(%arg0: i32, %arg1: i32, %arg2: i32) -> (i32, i32, i32, i32) {
    %c0_i32 = arith.constant 0 : i32
    %c0_i32_0 = arith.constant 0 : i32
    %c0_i32_1 = arith.constant 0 : i32
    return %arg0, %arg1, %c0_i32, %c0_i32_0 : i32, i32, i32, i32
  }
}

module attributes {stable_mosaic.version = 11 : i64} {
  func.func @apply_kernel(%arg0: i32, %arg1: i32, %arg2: memref<1x8x256xf32, #tpu.memory_space<vmem>>, %arg3: memref<1x8x256xf32, #tpu.memory_space<vmem>>, %arg4: memref<8x8xbf16, #tpu.memory_space<vmem>>, %arg5: memref<8x8xbf16, #tpu.memory_space<vmem>>, %arg6: memref<8x1xf32, #tpu.memory_space<vmem>>, %arg7: memref<8x1xf32, #tpu.memory_space<vmem>>, %arg8: memref<1x8x256xf32, #tpu.memory_space<vmem>>) attributes {dimension_semantics = [#tpu.dimension_semantics<parallel>, #tpu.dimension_semantics<parallel>], iteration_bounds = array<i64: 2, 1>, scalar_prefetch = 0 : i64, scratch_operands = 0 : i64, tpu.core_type = #tpu.core_type<tc>, window_params = [{transform_indices = @transform_0, window_bounds = array<i64: 1, 8, 256>}, {transform_indices = @transform_1, window_bounds = array<i64: 1, 8, 256>}, {pipeline_mode = #tpu.pipeline_mode<synchronous>, transform_indices = @transform_2, window_bounds = array<i64: 8, 8>}, {pipeline_mode = #tpu.pipeline_mode<synchronous>, transform_indices = @transform_3, window_bounds = array<i64: 8, 8>}, {pipeline_mode = #tpu.pipeline_mode<synchronous>, transform_indices = @transform_4, window_bounds = array<i64: 8, 1>}, {pipeline_mode = #tpu.pipeline_mode<synchronous>, transform_indices = @transform_5, window_bounds = array<i64: 8, 1>}, {transform_indices = @transform_6, window_bounds = array<i64: 1, 8, 256>}]} {
    %c0 = arith.constant 0 : index
    %c0_0 = arith.constant 0 : index
    %c0_1 = arith.constant 0 : index
    %0 = vector.load %arg2[%c0, %c0_0, %c0_1] : memref<1x8x256xf32, #tpu.memory_space<vmem>>, vector<1x8x256xf32>
    %1 = vector.shape_cast %0 : vector<1x8x256xf32> to vector<8x256xf32>
    %c0_2 = arith.constant 0 : index
    %c0_3 = arith.constant 0 : index
    %c0_4 = arith.constant 0 : index
    %2 = vector.load %arg3[%c0_2, %c0_3, %c0_4] : memref<1x8x256xf32, #tpu.memory_space<vmem>>, vector<1x8x256xf32>
    %3 = vector.shape_cast %2 : vector<1x8x256xf32> to vector<8x256xf32>
    %c0_5 = arith.constant 0 : index
    %c0_6 = arith.constant 0 : index
    %4 = vector.load %arg4[%c0_5, %c0_6] : memref<8x8xbf16, #tpu.memory_space<vmem>>, vector<8x8xbf16>
    %5 = arith.truncf %1 : vector<8x256xf32> to vector<8x256xbf16>
    %cst = arith.constant dense<0.000000e+00> : vector<8x256xf32>
    %6 = tpu.matmul %4, %5, %cst {dimension_numbers = #tpu.dot_dimension_numbers<[1], [0], [0], [1], [0, 0, 1, 1], [], []>} : vector<8x8xbf16>, vector<8x256xbf16>, vector<8x256xf32> -> vector<8x256xf32>
    %c0_7 = arith.constant 0 : index
    %c0_8 = arith.constant 0 : index
    %7 = vector.load %arg5[%c0_7, %c0_8] : memref<8x8xbf16, #tpu.memory_space<vmem>>, vector<8x8xbf16>
    %8 = arith.truncf %3 : vector<8x256xf32> to vector<8x256xbf16>
    %cst_9 = arith.constant dense<0.000000e+00> : vector<8x256xf32>
    %9 = tpu.matmul %7, %8, %cst_9 {dimension_numbers = #tpu.dot_dimension_numbers<[1], [0], [0], [1], [0, 0, 1, 1], [], []>} : vector<8x8xbf16>, vector<8x256xbf16>, vector<8x256xf32> -> vector<8x256xf32>
    %10 = arith.addf %6, %9 : vector<8x256xf32>
    %c0_10 = arith.constant 0 : index
    %c0_11 = arith.constant 0 : index
    %11 = vector.load %arg6[%c0_10, %c0_11] : memref<8x1xf32, #tpu.memory_space<vmem>>, vector<8x1xf32>
    %12 = vector.broadcast %11 : vector<8x1xf32> to vector<8x256xf32>
    %13 = arith.mulf %10, %12 : vector<8x256xf32>
    %c0_12 = arith.constant 0 : index
    %c0_13 = arith.constant 0 : index
    %14 = vector.load %arg7[%c0_12, %c0_13] : memref<8x1xf32, #tpu.memory_space<vmem>>, vector<8x1xf32>
    %15 = vector.broadcast %14 : vector<8x1xf32> to vector<8x256xf32>
    %16 = arith.addf %13, %15 : vector<8x256xf32>
    %cst_14 = arith.constant 5.000000e-01 : f32
    %17 = vector.broadcast %cst_14 : f32 to vector<8x256xf32>
    %18 = arith.mulf %17, %16 : vector<8x256xf32>
    %19 = math.tanh %18 : vector<8x256xf32>
    %cst_15 = arith.constant 1.000000e+00 : f32
    %20 = vector.broadcast %cst_15 : f32 to vector<8x256xf32>
    %21 = arith.addf %19, %20 : vector<8x256xf32>
    %cst_16 = arith.constant 5.000000e-01 : f32
    %22 = vector.broadcast %cst_16 : f32 to vector<8x256xf32>
    %23 = arith.mulf %22, %21 : vector<8x256xf32>
    %24 = arith.mulf %23, %1 : vector<8x256xf32>
    %25 = arith.addf %3, %24 : vector<8x256xf32>
    %c0_17 = arith.constant 0 : index
    %c0_18 = arith.constant 0 : index
    %c0_19 = arith.constant 0 : index
    %26 = vector.load %arg8[%c0_17, %c0_18, %c0_19] : memref<1x8x256xf32, #tpu.memory_space<vmem>>, vector<1x8x256xf32>
    %27 = vector.shape_cast %26 : vector<1x8x256xf32> to vector<8x256xf32>
    %28 = vector.shape_cast %25 : vector<8x256xf32> to vector<1x8x256xf32>
    tpu.vector_store %arg8[%c0_17, %c0_18, %c0_19], %28 {strides = array<i32>} : memref<1x8x256xf32, #tpu.memory_space<vmem>>, vector<1x8x256xf32>,
    return
  }
  func.func @transform_0(%arg0: i32, %arg1: i32) -> (i32, i32, i32) {
    %c0_i32 = arith.constant 0 : i32
    %c0_i32_0 = arith.constant 0 : i32
    return %arg0, %c0_i32, %arg1 : i32, i32, i32
  }
  func.func @transform_1(%arg0: i32, %arg1: i32) -> (i32, i32, i32) {
    %c0_i32 = arith.constant 0 : i32
    %c0_i32_0 = arith.constant 0 : i32
    return %arg0, %c0_i32, %arg1 : i32, i32, i32
  }
  func.func @transform_2(%arg0: i32, %arg1: i32) -> (i32, i32) {
    %c0_i32 = arith.constant 0 : i32
    %c0_i32_0 = arith.constant 0 : i32
    %c0_i32_1 = arith.constant 0 : i32
    return %c0_i32, %c0_i32_0 : i32, i32
  }
  func.func @transform_3(%arg0: i32, %arg1: i32) -> (i32, i32) {
    %c0_i32 = arith.constant 0 : i32
    %c0_i32_0 = arith.constant 0 : i32
    %c0_i32_1 = arith.constant 0 : i32
    return %c0_i32, %c0_i32_0 : i32, i32
  }
  func.func @transform_4(%arg0: i32, %arg1: i32) -> (i32, i32) {
    %c0_i32 = arith.constant 0 : i32
    %c0_i32_0 = arith.constant 0 : i32
    %c0_i32_1 = arith.constant 0 : i32
    return %c0_i32, %c0_i32_0 : i32, i32
  }
  func.func @transform_5(%arg0: i32, %arg1: i32) -> (i32, i32) {
    %c0_i32 = arith.constant 0 : i32
    %c0_i32_0 = arith.constant 0 : i32
    %c0_i32_1 = arith.constant 0 : i32
    return %c0_i32, %c0_i32_0 : i32, i32
  }
  func.func @transform_6(%arg0: i32, %arg1: i32) -> (i32, i32, i32) {
    %c0_i32 = arith.constant 0 : i32
    %c0_i32_0 = arith.constant 0 : i32
    return %arg0, %c0_i32, %arg1 : i32, i32, i32
  }
}

</mosaic_0001>

<bundles_post_ra>
// kernel: interaction_block_forward.2
= control target key start
LH: loop header
LB: loop body
LE: loop exit
PB: predicated region body
PF: predicated region fallthrough
CT: control target
= control target key end

     0   :  { %s617_s15 = smov 0   ;;  %s619_s16 = smov 0   ;;  %s663_s0 = inlined_call_operand.vmem [shape: f32[2,8,256], index: 0, kind: input, shape index: {}]   ;;  %s664_s1 = inlined_call_operand.vmem [shape: f32[2,8,256], index: 1, kind: input, shape index: {}]   ;;  %s665_s2 = inlined_call_operand.vmem [shape: bf16[8,8], index: 2, kind: input, shape index: {}]   ;;  %s666_s3 = inlined_call_operand.vmem [shape: bf16[8,8], index: 3, kind: input, shape index: {}]   ;;  %s667_s4 = inlined_call_operand.vmem [shape: f32[2,1,8,2], index: 4, kind: output, shape index: {}]  }
   0x1   :  { %s621_s17 = smov 0  }
   0x2 LB: > { %s33_s18 = sadd.s32 1, %s584_s16  ;;  %p524_p0 = scmp.ge.s32.totalorder %s588_s17, 1  ;;  %s588_s17 = sphi %s621_s17, %s14_s17   ;;  %s584_s16 = sphi %s619_s16, %s669_s16   ;;  %s580_s15 = sphi %s617_s15, %s668_s15  }
   0x3   : > { %p35_p1 = scmp.ge.s32.totalorder %s33_s18, 2  ;;  %p215_p2 = scmp.lt.s32.totalorder %s588_s17, 3 }
   0x5   : > { %s671_s18 = smov (%p35_p1, %s33_s18), 0  ;;  %p216_p3 = pnand %p524_p0, %p215_p2 }
   0x6   : > { %p260_p4 = scmp.lt.s32.totalorder (!%p216_p3), %s580_s15, 1  ;;  %v590_v0 = vmov (!%p216_p3), 0   ;;  %vm310_vm0 = vcmask (!%p216_p3), 1043456   ;;  %v303_v11 = vld [vmem:[%s666_s3] sm:$0xf] (!%p216_p3)  ;;  %vm306_vm1 = vcmask (!%p216_p3), 64512  }
   0x7   : > { %219 = sbr.rel (%p216_p3) target bundleno = 392 (0x188), region = 36  ;;  %349 = vmatprep.mubr.bf16.mxu1 (!%p216_p3), %v590_v0  ;;  %399 = vmatprep.mubr.bf16.mxu0 (!%p216_p3), %v590_v0  ;;  %v300_v12 = vld [vmem:[%s665_s2] sm:$0xf] (!%p216_p3)  ;;  %vm294_vm2 = vcmask (!%p216_p3), 15360   ;;  %v591_v27 = vmov (!%p216_p3), 0.0   ;;  %vm417_vm3 = vcmask (!%p216_p3), 7168  }
   0xe   : > { %s673_s15 = smov (!%p260_p4, %s580_s15), 1 }
   0xf   : > { %s536_s19 = sshll.u32 %s673_s15, 4  ;;  %s529_s30 = sshll.u32 %s673_s15, 3 }
  0x10   : > { %s279_s22 = scalar_lea.vmem %s664_s1, %s536_s19  ;;  %s267_s25 = scalar_lea.vmem %s663_s0, %s536_s19 }
  0x11   : > { %v299_v1 = vld [vmem:[%s279_s22 + $0x8] sm:$0xff]  ;;  %v298_v3 = vld [vmem:[%s279_s22] sm:$0xff]  ;;  %s288_s7 = scalar_lea.vmem %s667_s4, %s529_s30 }
  0x12   : > { %v297_v2 = vld [vmem:[%s267_s25 + $0x8] sm:$0xff]  ;;  %v305_v4 = vpack.c.bf16 %v299_v1, %v299_v1  ;;  %v304_v6 = vpack.c.bf16 %v298_v3, %v298_v3  ;;  %v296_v7 = vld [vmem:[%s267_s25] sm:$0xff]  ;;  %295 = vst.msk [vmem:[%s288_s7] sm:$0xff] %vm294_vm2, %v591_v27 }
  0x13   : > { %v302_v5 = vpack.c.bf16 %v297_v2, %v297_v2  ;;  %v301_v8 = vpack.c.bf16 %v296_v7, %v296_v7 }
  0x14   : > { %530 = vmatprep.subr.msk.bf16.mxu1 %vm310_vm0, %v305_v4  ;;  %v312_v9 = vsel %vm310_vm0, %v304_v6, 0 }
  0x15   : > { %532 = vmatprep.subr.msk.bf16.mxu0 %vm310_vm0, %v302_v5  ;;  %318 = vmatpush1.bf16.msra.mxu1 %v312_v9  ;;  %v362_v10 = vsel %vm310_vm0, %v301_v8, 0 }
  0x16   : > { %368 = vmatpush1.bf16.msra.mxu0 %v362_v10 }
  0x18   : > { %531 = vmatmul.mubr.msk.bf16.vlgmr.msra.gmra.mrb[0].mxu1 %vm306_vm1, %v303_v11 }
  0x19   : > { %533 = vmatmul.mubr.msk.bf16.vlgmr.msra.gmra.mrb[0].mxu0 %vm306_vm1, %v300_v12  ;;  %v416_v29 = vld [vmem:[%s288_s7] sm:$0xff] }
  0xeb   : > { %v351_v13 = vpop.f32.mrb[0].mxu1 }
  0xec   : > { %v401_v14 = vpop.f32.mrb[0].mxu0  ;;  %v353_v15 = vpop.f32.mrb[1].mxu1 }
  0xed   : > { %v402_v16 = vadd.f32 %v401_v14, %v351_v13  ;;  %v403_v17 = vpop.f32.mrb[1].mxu0  ;;  %v355_v18 = vpop.f32.mrb[2].mxu1 }
  0xee   : > { %v404_v19 = vadd.f32 %v403_v17, %v353_v15  ;;  %v405_v20 = vpop.f32.mrb[2].mxu0  ;;  %v356_v21 = vpop.f32.mrb[3].mxu1 }
  0xef   : > { %v411_v22 = vmul.f32 %v402_v16, %v402_v16  ;;  %v406_v23 = vpop.f32.mrb[3].mxu0 }
  0xf0   : > { %v412_v24 = vmul.f32 %v404_v19, %v404_v19  ;;  %v408_v25 = vadd.f32 %v404_v19, %v402_v16 }
  0xf2   : > { %409 = vadd.xlane.f32.xlu0 %v408_v25  ;;  %v413_v26 = vadd.f32 %v412_v24, %v411_v22 }
  0xf6   : > { %414 = vadd.xlane.f32.xlu0 %v413_v26 }
 0x17f   : > { %v410_v28 = vpop.xlane.xlu0 %409 }
 0x183   : > { %v415_v30 = vpop.xlane.xlu0 %414 }
 0x184   : > { %v418_v31 = vsel %vm417_vm3, %v410_v28, %v415_v30 }
 0x185   : > { %v419_v32 = vadd.f32 %v418_v31, %v416_v29 }
 0x187   : > { %421 = vst.msk [vmem:[%s288_s7] sm:$0xff] %vm294_vm2, %v419_v32 }
 0x188 PF: > { %s14_s17 = sadd.s32 1, %s588_s17   ;;  %s668_s15 = smov %s584_s16 }
 0x189   : > { %p11_p5 = scmp.ge.s32.totalorder %s14_s17, 4   ;;  %s669_s16 = smov %s671_s18 }
 0x18b   :  { %13 = sbr.rel (!%p11_p5) target bundleno = 2 (0x2), region = 73 }

// kernel: interaction_block_forward.3
= control target key start
LH: loop header
LB: loop body
LE: loop exit
PB: predicated region body
PF: predicated region fallthrough
CT: control target
= control target key end

     0   :  { %s687_s21 = smov 0   ;;  %s689_s22 = smov 0   ;;  %s740_s0 = inlined_call_operand.vmem [shape: f32[2,8,256], index: 0, kind: input, shape index: {}]   ;;  %s741_s1 = inlined_call_operand.vmem [shape: f32[2,8,256], index: 1, kind: input, shape index: {}, may-alias: {1,6}]   ;;  %s742_s2 = inlined_call_operand.vmem [shape: bf16[8,8], index: 2, kind: input, shape index: {}]   ;;  %s743_s3 = inlined_call_operand.vmem [shape: bf16[8,8], index: 3, kind: input, shape index: {}]   ;;  %s744_s4 = inlined_call_operand.vmem [shape: f32[8,1], index: 4, kind: input, shape index: {}]   ;;  %s745_s5 = inlined_call_operand.vmem [shape: f32[8,1], index: 5, kind: input, shape index: {}]   ;;  %s746_s6 = inlined_call_operand.vmem [shape: f32[2,8,256], index: 6, kind: output, shape index: {}, may-alias: {1,6}]  }
   0x1   :  { %s691_s23 = smov 0  }
   0x2 LB: > { %s28_s24 = sadd.s32 1, %s645_s22  ;;  %p579_p0 = scmp.ge.s32.totalorder %s649_s23, 1  ;;  %s649_s23 = sphi %s691_s23, %s16_s23   ;;  %s645_s22 = sphi %s689_s22, %s748_s22   ;;  %s641_s21 = sphi %s687_s21, %s747_s21  }
   0x3   : > { %p30_p1 = scmp.ge.s32.totalorder %s28_s24, 2  ;;  %p250_p2 = scmp.lt.s32.totalorder %s649_s23, 3 }
   0x5   : > { %s750_s24 = smov (%p30_p1, %s28_s24), 0  ;;  %p251_p3 = pnand %p579_p0, %p250_p2 }
   0x6   : > { %p298_p4 = scmp.lt.s32.totalorder (!%p251_p3), %s641_s21, 1  ;;  %v651_v0 = vmov (!%p251_p3), 0   ;;  %v440_v1 = vld [vmem:[%s744_s4] sm:$0xff] (!%p251_p3)  ;;  %vm342_vm0 = vcmask (!%p251_p3), 1043456   ;;  %vm338_vm1 = vcmask (!%p251_p3), 64512  }
   0x7   : > { %254 = sbr.rel (%p251_p3) target bundleno = 266 (0x10a), region = 44  ;;  %381 = vmatprep.mubr.bf16.mxu1 (!%p251_p3), %v651_v0  ;;  %431 = vmatprep.mubr.bf16.mxu0 (!%p251_p3), %v651_v0  ;;  %v448_v2 = vld [vmem:[%s745_s5] sm:$0xff] (!%p251_p3) }
   0x8   : > { %622 = vset.pattern.permute.xlu0 (!%p251_p3), %v651_v0  ;;  %v335_v13 = vld [vmem:[%s743_s3] sm:$0xf] (!%p251_p3) }
   0x9   : > { %443 = vperm.xlu0 (!%p251_p3), %622, %v440_v1   ;;  %v332_v14 = vld [vmem:[%s742_s2] sm:$0xf] (!%p251_p3) }
   0xd   : > { %451 = vperm.xlu0 (!%p251_p3), %622, %v448_v2  }
   0xe   : > { %s752_s21 = smov (!%p298_p4, %s641_s21), 1 }
   0xf   : > { %s708_s27 = sshll.u32 %s752_s21, 4 }
  0x10   : > { %s315_s8 = scalar_lea.vmem %s741_s1, %s708_s27  ;;  %s305_s11 = scalar_lea.vmem %s740_s0, %s708_s27 }
  0x11   : > { %v331_v3 = vld [vmem:[%s315_s8 + $0x8] sm:$0xff]  ;;  %v330_v4 = vld [vmem:[%s315_s8] sm:$0xff]  ;;  %s325_s18 = scalar_lea.vmem %s746_s6, %s708_s27 }
  0x12   : > { %v337_v5 = vpack.c.bf16 %v331_v3, %v331_v3  ;;  %v329_v6 = vld [vmem:[%s305_s11 + $0x8] sm:$0xff]  ;;  %v336_v7 = vpack.c.bf16 %v330_v4, %v330_v4  ;;  %v328_v8 = vld [vmem:[%s305_s11] sm:$0xff] }
  0x13   : > { %v334_v9 = vpack.c.bf16 %v329_v6, %v329_v6  ;;  %v333_v10 = vpack.c.bf16 %v328_v8, %v328_v8 }
  0x14   : > { %586 = vmatprep.subr.msk.bf16.mxu1 %vm342_vm0, %v337_v5  ;;  %v344_v11 = vsel %vm342_vm0, %v336_v7, 0 }
  0x15   : > { %588 = vmatprep.subr.msk.bf16.mxu0 %vm342_vm0, %v334_v9  ;;  %350 = vmatpush1.bf16.msra.mxu1 %v344_v11  ;;  %v394_v12 = vsel %vm342_vm0, %v333_v10, 0 }
  0x16   : > { %400 = vmatpush1.bf16.msra.mxu0 %v394_v12 }
  0x18   : > { %587 = vmatmul.mubr.msk.bf16.vlgmr.msra.gmra.mrb[0].mxu1 %vm338_vm1, %v335_v13 }
  0x19   : > { %589 = vmatmul.mubr.msk.bf16.vlgmr.msra.gmra.mrb[0].mxu0 %vm338_vm1, %v332_v14 }
  0x88   : > { %v444_v15 = vpop.permute.xlu0 %443 }
  0x8c   : > { %v452_v27 = vpop.permute.xlu0 %451 }
  0xeb   : > { %v383_v16 = vpop.f32.mrb[0].mxu1 }
  0xec   : > { %v433_v17 = vpop.f32.mrb[0].mxu0  ;;  %v385_v18 = vpop.f32.mrb[1].mxu1 }
  0xed   : > { %v434_v19 = vadd.f32 %v433_v17, %v383_v16  ;;  %v435_v20 = vpop.f32.mrb[1].mxu0  ;;  %v387_v21 = vpop.f32.mrb[2].mxu1 }
  0xee   : > { %v436_v22 = vadd.f32 %v435_v20, %v385_v18  ;;  %v437_v23 = vpop.f32.mrb[2].mxu0  ;;  %v388_v24 = vpop.f32.mrb[3].mxu1 }
  0xef   : > { %v446_v25 = vmul.f32 %v444_v15, %v434_v19  ;;  %v438_v26 = vpop.f32.mrb[3].mxu0 }
  0xf0   : > { %v447_v28 = vmul.f32 %v444_v15, %v436_v22 }
  0xf1   : > { %v454_v29 = vadd.f32 %v452_v27, %v446_v25 }
  0xf2   : > { %v455_v30 = vadd.f32 %v452_v27, %v447_v28 }
  0xf3   : > { %v456_v31 = vmul.f32 0.5, %v454_v29 }
  0xf4   : > { %v457_v32 = vmul.f32 0.5, %v455_v30 }
  0xf5   : > { %623 = vtanh.f32 %v456_v31 }
  0xf6   : > { %625 = vtanh.f32 %v457_v32 }
  0xff   : > { %v624_v33 = vpop.eup %623 }
 0x100   : > { %v626_v34 = vpop.eup %625  ;;  %v460_v35 = vadd.f32 1.0, %v624_v33 }
 0x101   : > { %v461_v36 = vadd.f32 1.0, %v626_v34 }
 0x102   : > { %v462_v37 = vmul.f32 0.5, %v460_v35 }
 0x103   : > { %v463_v38 = vmul.f32 0.5, %v461_v36 }
 0x104   : > { %v464_v39 = vmul.f32 %v462_v37, %v328_v8 }
 0x105   : > { %v465_v40 = vmul.f32 %v463_v38, %v329_v6 }
 0x106   : > { %v466_v41 = vadd.f32 %v464_v39, %v330_v4 }
 0x107   : > { %v467_v42 = vadd.f32 %v465_v40, %v331_v3 }
 0x108   : > { %468 = vst [vmem:[%s325_s18] sm:$0xff] %v466_v41 }
 0x109   : > { %469 = vst [vmem:[%s325_s18 + $0x8] sm:$0xff] %v467_v42 }
 0x10a PF: > { %s16_s23 = sadd.s32 1, %s649_s23   ;;  %s747_s21 = smov %s645_s22 }
 0x10b   : > { %p13_p5 = scmp.ge.s32.totalorder %s16_s23, 4   ;;  %s748_s22 = smov %s750_s24 }
 0x10d   :  { %15 = sbr.rel (!%p13_p5) target bundleno = 2 (0x2), region = 77 }

</bundles_post_ra>
